<compile_context>
chip_gen: v6e
topology: v6e:2x2x1
jax: 0.10.0
libtpu: 0.0.40
codegen_flags: <defaults>
</compile_context>

<pallas_src>
import jax
import jax.numpy as jnp
from jax import lax
from jax.experimental import pallas as pl
from jax.experimental.pallas import tpu as pltpu


# ---------------------------------------------------------------------------
# Hardware-aware knobs
# ---------------------------------------------------------------------------
def _round_up(x, m):
    return -(-x // m) * m


def _device_kind():
    try:
        return jax.devices()[0].device_kind.lower()
    except Exception:
        return ""


def _num_cores():
    # Two TensorCores per chip only on v7x-class parts; 1 elsewhere.
    kind = _device_kind()
    return 2 if ("v7" in kind or "tpu7" in kind or "7x" in kind) else 1


def _budget():
    """(per-input tile bytes, vmem_limit_bytes) by TPU generation."""
    kind = _device_kind()
    if "v7" in kind or "tpu7" in kind or "7x" in kind:
        return 4 * 1024 * 1024, 48 * 1024 * 1024      # 64 MiB physical VMEM
    if "v5" in kind or "v6" in kind:
        return 6 * 1024 * 1024, 80 * 1024 * 1024      # 128 MiB physical VMEM
    return 2 * 1024 * 1024, 32 * 1024 * 1024          # conservative default


def _choose_tm(rows, lanes, itemsize, tile_bytes):
    """Row tile (multiple of 8, never exceeding the row extent).  rows must be >= 8."""
    lanes_pad = _round_up(lanes, 128)                  # VMEM lane padding
    tm = max(1, tile_bytes // (lanes_pad * max(1, itemsize)))
    tm = max(8, (tm // 8) * 8)
    return min(tm, (rows // 8) * 8)


def _compiler_params(vmem_limit):
    return pltpu.CompilerParams(
        dimension_semantics=("parallel", "arbitrary"),
        vmem_limit_bytes=vmem_limit,
    )


def _make_row_map(steps, total_blocks, clamp):
    # Clamp fully out-of-range logical blocks onto the last valid block; the kernel's
    # row mask zeroes their contribution.
    if clamp:
        last = total_blocks - 1
        return lambda c, i: (jnp.minimum(c * steps + i, last), 0)
    return lambda c, i: (c * steps + i, 0)


def _split_blocks(rows, tm):
    """grid layout: (ncores, steps) covering cdiv(rows, tm) row blocks."""
    total_blocks = -(-rows // tm)
    ncores = _num_cores()
    if total_blocks < 2 * ncores:
        ncores = 1
    steps = -(-total_blocks // ncores)
    clamp = (ncores * steps != total_blocks)
    return total_blocks, ncores, steps, clamp


# ---------------------------------------------------------------------------
# Kernel 1: dense (same-shape) target.  Accumulate |pred - target| per tile.
# ---------------------------------------------------------------------------
def _make_dense_kernel(rows, tm, steps, lanes):
    def kernel(pred_ref, tgt_ref, out_ref, acc_ref):
        c = pl.program_id(0)
        i = pl.program_id(1)

        @pl.when(i == 0)
        def _():
            acc_ref[...] = jnp.zeros_like(acc_ref)

        d = jnp.abs(pred_ref[...].astype(jnp.float32)
                    - tgt_ref[...].astype(jnp.float32))          # (tm, lanes)
        # Row-validity mask (boundary blocks read unspecified data; jnp.where so
        # NaN garbage cannot leak through a multiply-by-zero).
        row0 = (c * steps + i) * tm
        ridx = row0 + lax.broadcasted_iota(jnp.int32, (tm, lanes), 0)
        d = jnp.where(ridx < rows, d, 0.0)
        # VPU-only fold of 8-row groups into the resident (8, lanes) accumulator.
        acc_ref[...] += d.reshape(tm // 8, 8, lanes).sum(axis=0)

        @pl.when(i == steps - 1)
        def _():
            out_ref[...] = jnp.sum(acc_ref[...], axis=1, keepdims=True)  # (8, 1)

    return kernel


# ---------------------------------------------------------------------------
# Kernel 2: integer-label target.  One-hot built in-kernel from a (tm, 1) int32
# label block; only the pred stream is real HBM traffic.
# ---------------------------------------------------------------------------
def _make_onehot_kernel(rows, tm, steps, ncls):
    def kernel(pred_ref, lab_ref, out_ref, acc_ref):
        c = pl.program_id(0)
        i = pl.program_id(1)

        @pl.when(i == 0)
        def _():
            acc_ref[...] = jnp.zeros_like(acc_ref)

        p = pred_ref[...].astype(jnp.float32)                     # (tm, ncls)
        cls = lax.broadcasted_iota(jnp.int32, (tm, ncls), 1)
        onehot = (cls == lab_ref[...]).astype(jnp.float32)
        d = jnp.abs(p - onehot)
        row0 = (c * steps + i) * tm
        ridx = row0 + lax.broadcasted_iota(jnp.int32, (tm, ncls), 0)
        d = jnp.where(ridx < rows, d, 0.0)
        acc_ref[...] += d.reshape(tm // 8, 8, ncls).sum(axis=0)

        @pl.when(i == steps - 1)
        def _():
            out_ref[...] = jnp.sum(acc_ref[...], axis=1, keepdims=True)  # (8, 1)

    return kernel


# ---------------------------------------------------------------------------
# Wrappers
# ---------------------------------------------------------------------------
def _sum_abs_diff_dense(pred, target):
    n = pred.size
    itemsize = max(pred.dtype.itemsize, target.dtype.itemsize)
    tile_bytes, vmem_limit = _budget()

    # Widest lane-dense slab width that divides n -> the reshape is a free bitcast.
    lanes = None
    for cand in (512, 256, 128):
        if n % cand == 0:
            lanes = cand
            break

    flat_p = pred.reshape(-1)
    flat_t = target.reshape(-1)
    if lanes is None:
        # Ragged element count (n % 128 != 0): one unavoidable pad copy.
        lanes = 512
        rows = max(-(-n // lanes), 8)
        total = rows * lanes
        flat_p = jnp.pad(flat_p, (0, total - n))
        flat_t = jnp.pad(flat_t, (0, total - n))
    else:
        rows = n // lanes
        if rows < 8:                       # tiny input: pad a few KiB of rows
            total = 8 * lanes
            flat_p = jnp.pad(flat_p, (0, total - n))
            flat_t = jnp.pad(flat_t, (0, total - n))
            rows = 8
    p2 = flat_p.reshape(rows, lanes)
    t2 = flat_t.reshape(rows, lanes)

    tm = _choose_tm(rows, lanes, itemsize, tile_bytes)
    total_blocks, ncores, steps, clamp = _split_blocks(rows, tm)
    row_map = _make_row_map(steps, total_blocks, clamp)

    partials = pl.pallas_call(
        _make_dense_kernel(rows, tm, steps, lanes),
        out_shape=jax.ShapeDtypeStruct((ncores * 8, 1), jnp.float32),
        grid_spec=pltpu.PrefetchScalarGridSpec(
            num_scalar_prefetch=0,
            grid=(ncores, steps),
            in_specs=[
                pl.BlockSpec((tm, lanes), row_map),
                pl.BlockSpec((tm, lanes), row_map),
            ],
            out_specs=pl.BlockSpec((8, 1), lambda c, i: (c, 0)),
            scratch_shapes=[pltpu.VMEM((8, lanes), jnp.float32)],
        ),
        compiler_params=_compiler_params(vmem_limit),
    )(p2, t2)
    return jnp.sum(partials)


def _sum_abs_diff_onehot(pred, labels):
    b, ncls = pred.shape
    itemsize = pred.dtype.itemsize
    tile_bytes, vmem_limit = _budget()

    labels = labels.astype(jnp.int32).reshape(b, 1)
    if b < 8:                              # tiny batch: pad a handful of rows
        pred = jnp.pad(pred, ((0, 8 - b), (0, 0)))
        labels = jnp.pad(labels, ((0, 8 - b), (0, 0)), constant_values=-1)
        b = 8

    tm = _choose_tm(b, ncls, itemsize, tile_bytes)
    total_blocks, ncores, steps, clamp = _split_blocks(b, tm)
    row_map = _make_row_map(steps, total_blocks, clamp)

    partials = pl.pallas_call(
        _make_onehot_kernel(b, tm, steps, ncls),
        out_shape=jax.ShapeDtypeStruct((ncores * 8, 1), jnp.float32),
        grid_spec=pltpu.PrefetchScalarGridSpec(
            num_scalar_prefetch=0,
            grid=(ncores, steps),
            in_specs=[
                pl.BlockSpec((tm, ncls), row_map),   # last dim = full C (no column pad)
                pl.BlockSpec((tm, 1), row_map),
            ],
            out_specs=pl.BlockSpec((8, 1), lambda c, i: (c, 0)),
            scratch_shapes=[pltpu.VMEM((8, ncls), jnp.float32)],
        ),
        compiler_params=_compiler_params(vmem_limit),
    )(pred, labels)
    return jnp.sum(partials)


def l1_loss(pred, target):
    """Matches L1Loss.forward: one-hot target for 1-D labels, then mean |pred - target|."""
    pred = jnp.asarray(pred)
    target = jnp.asarray(target)

    if pred.ndim > 1 and target.ndim == 1:
        if pred.ndim == 2 and jnp.issubdtype(target.dtype, jnp.integer):
            # Fused path: one-hot built in-kernel; only pred streams from HBM.
            return _sum_abs_diff_onehot(pred, target) / jnp.float32(pred.size)
        # Unusual label shapes: fall back to materializing the one-hot target.
        target = jax.nn.one_hot(target, pred.shape[1], dtype=jnp.float32)

    if pred.shape != target.shape:
        pred, target = jnp.broadcast_arrays(pred, target)
    return _sum_abs_diff_dense(pred, target) / jnp.float32(pred.size)


if __name__ == "__main__":
    key = jax.random.PRNGKey(0)
    kp, kt, kd1, kd2 = jax.random.split(key, 4)

    # Case 1 (module's primary path): pred (batch=16, num_classes=32), int labels (16,)
    pred = jax.random.normal(kp, (16, 32), dtype=jnp.float32)
    target = jax.random.randint(kt, (16,), 0, 32, dtype=jnp.int32)
    loss = jax.block_until_ready(l1_loss(pred, target))
    ref = jnp.mean(jnp.abs(pred - jax.nn.one_hot(target, 32, dtype=jnp.float32)))
    assert jnp.allclose(loss, ref, rtol=1e-6, atol=1e-6), (loss, ref)

    # Case 2: dense same-shape target (no one-hot branch), f32, n % 512 == 0 (no pad).
    a = jax.random.normal(kd1, (2, 4, 16, 16), dtype=jnp.float32)
    b = jax.random.normal(kd2, (2, 4, 16, 16), dtype=jnp.float32)
    loss2 = jax.block_until_ready(l1_loss(a, b))
    ref2 = jnp.mean(jnp.abs(a - b))
    assert jnp.allclose(loss2, ref2, rtol=1e-6, atol=1e-6), (loss2, ref2)

    # Case 3: bf16 inputs stay bf16 in HBM (dtype-aware tiling; kernel upcasts per tile).
    a16 = a.astype(jnp.bfloat16)
    b16 = b.astype(jnp.bfloat16)
    loss3 = jax.block_until_ready(l1_loss(a16, b16))
    ref3 = jnp.mean(jnp.abs(a16.astype(jnp.float32) - b16.astype(jnp.float32)))
    assert jnp.allclose(loss3, ref3, rtol=1e-5, atol=1e-5), (loss3, ref3)

    # Case 4: ragged element count (n % 128 != 0) exercises the pad+mask fallback.
    c1 = jax.random.normal(kd1, (3, 5, 7), dtype=jnp.float32)
    c2 = jax.random.normal(kd2, (3, 5, 7), dtype=jnp.float32)
    loss4 = jax.block_until_ready(l1_loss(c1, c2))
    ref4 = jnp.mean(jnp.abs(c1 - c2))
    assert jnp.allclose(loss4, ref4, rtol=1e-6, atol=1e-6), (loss4, ref4)

    # Case 5: one-hot path with C not a multiple of 128 and B not a multiple of tm
    # (exercises the in-kernel boundary row mask, no padding copies).
    pred5 = jax.random.normal(kp, (20, 40), dtype=jnp.float32)
    target5 = jax.random.randint(kt, (20,), 0, 40, dtype=jnp.int32)
    loss5 = jax.block_until_ready(l1_loss(pred5, target5))
    ref5 = jnp.mean(jnp.abs(pred5 - jax.nn.one_hot(target5, 40, dtype=jnp.float32)))
    assert jnp.allclose(loss5, ref5, rtol=1e-6, atol=1e-6), (loss5, ref5)

    print("KERNEL_OK")
</pallas_src>

<mosaic_0001>
module attributes {stable_mosaic.version = 11 : i64} {
  func.func @kernel(%arg0: i32, %arg1: i32, %arg2: memref<16x32xf32, #tpu.memory_space<vmem>>, %arg3: memref<16x1xi32, #tpu.memory_space<vmem>>, %arg4: memref<8x1xf32, #tpu.memory_space<vmem>>, %arg5: memref<8x32xf32, #tpu.memory_space<vmem>>) attributes {dimension_semantics = [#tpu.dimension_semantics<parallel>, #tpu.dimension_semantics<arbitrary>], iteration_bounds = array<i64: 1, 1>, scalar_prefetch = 0 : i64, scratch_operands = 1 : i64, tpu.core_type = #tpu.core_type<tc>, window_params = [{transform_indices = @transform_0, window_bounds = array<i64: 16, 32>}, {transform_indices = @transform_1, window_bounds = array<i64: 16, 1>}, {transform_indices = @transform_2, window_bounds = array<i64: 8, 1>}]} {
    %c0_i32 = arith.constant 0 : i32
    %0 = arith.cmpi eq, %arg1, %c0_i32 : i32
    %1 = arith.extui %0 : i1 to i32
    %c0_i32_0 = arith.constant 0 : i32
    %2 = arith.cmpi ne, %1, %c0_i32_0 : i32
    scf.if %2 {
      %cst_12 = arith.constant 0.000000e+00 : f32
      %30 = vector.broadcast %cst_12 : f32 to vector<8x32xf32>
      %c0_13 = arith.constant 0 : index
      %c0_14 = arith.constant 0 : index
      %31 = vector.load %arg5[%c0_13, %c0_14] : memref<8x32xf32, #tpu.memory_space<vmem>>, vector<8x32xf32>
      tpu.vector_store %arg5[%c0_13, %c0_14], %30 {strides = array<i32>} : memref<8x32xf32, #tpu.memory_space<vmem>>, vector<8x32xf32>,
    } else {
    }
    %c0 = arith.constant 0 : index
    %c0_1 = arith.constant 0 : index
    %3 = vector.load %arg2[%c0, %c0_1] : memref<16x32xf32, #tpu.memory_space<vmem>>, vector<16x32xf32>
    %4 = tpu.iota {dimensions = array<i32: 1>} : vector<16x32xi32>
    %c0_2 = arith.constant 0 : index
    %c0_3 = arith.constant 0 : index
    %5 = vector.load %arg3[%c0_2, %c0_3] : memref<16x1xi32, #tpu.memory_space<vmem>>, vector<16x1xi32>
    %6 = vector.broadcast %5 : vector<16x1xi32> to vector<16x32xi32>
    %7 = arith.cmpi eq, %4, %6 : vector<16x32xi32>
    %8 = arith.extui %7 : vector<16x32xi1> to vector<16x32xi32>
    %9 = arith.sitofp %8 : vector<16x32xi32> to vector<16x32xf32>
    %10 = arith.subf %3, %9 : vector<16x32xf32>
    %11 = math.absf %10 : vector<16x32xf32>
    %c1_i32 = arith.constant 1 : i32
    %12 = arith.muli %arg0, %c1_i32 : i32
    %13 = arith.addi %12, %arg1 : i32
    %c16_i32 = arith.constant 16 : i32
    %14 = arith.muli %13, %c16_i32 : i32
    %15 = tpu.iota {dimensions = array<i32: 0>} : vector<16x32xi32>
    %16 = vector.broadcast %14 : i32 to vector<16x32xi32>
    %17 = arith.addi %16, %15 : vector<16x32xi32>
    %c16_i32_4 = arith.constant 16 : i32
    %18 = vector.broadcast %c16_i32_4 : i32 to vector<16x32xi32>
    %19 = arith.cmpi slt, %17, %18 : vector<16x32xi32>
    %cst = arith.constant 0.000000e+00 : f32
    %20 = vector.broadcast %cst : f32 to vector<16x32xf32>
    %21 = arith.select %19, %11, %20 : vector<16x32xi1>, vector<16x32xf32>
    %c0_5 = arith.constant 0 : index
    %c0_6 = arith.constant 0 : index
    %22 = vector.load %arg5[%c0_5, %c0_6] : memref<8x32xf32, #tpu.memory_space<vmem>>, vector<8x32xf32>
    %23 = vector.shape_cast %21 : vector<16x32xf32> to vector<2x8x32xf32>
    %cst_7 = arith.constant dense<0.000000e+00> : vector<8x32xf32>
    %24 = vector.multi_reduction <add>, %23, %cst_7 [0] : vector<2x8x32xf32> to vector<8x32xf32>
    %25 = arith.addf %22, %24 : vector<8x32xf32>
    %c0_8 = arith.constant 0 : index
    %c0_9 = arith.constant 0 : index
    %26 = vector.load %arg5[%c0_8, %c0_9] : memref<8x32xf32, #tpu.memory_space<vmem>>, vector<8x32xf32>
    tpu.vector_store %arg5[%c0_8, %c0_9], %25 {strides = array<i32>} : memref<8x32xf32, #tpu.memory_space<vmem>>, vector<8x32xf32>,
    %c0_i32_10 = arith.constant 0 : i32
    %27 = arith.cmpi eq, %arg1, %c0_i32_10 : i32
    %28 = arith.extui %27 : i1 to i32
    %c0_i32_11 = arith.constant 0 : i32
    %29 = arith.cmpi ne, %28, %c0_i32_11 : i32
    scf.if %29 {
      %c0_12 = arith.constant 0 : index
      %c0_13 = arith.constant 0 : index
      %30 = vector.load %arg5[%c0_12, %c0_13] : memref<8x32xf32, #tpu.memory_space<vmem>>, vector<8x32xf32>
      %cst_14 = arith.constant dense<0.000000e+00> : vector<8xf32>
      %31 = vector.multi_reduction <add>, %30, %cst_14 [1] : vector<8x32xf32> to vector<8xf32>
      %32 = vector.shape_cast %31 : vector<8xf32> to vector<8x1xf32>
      %c0_15 = arith.constant 0 : index
      %c0_16 = arith.constant 0 : index
      %33 = vector.load %arg4[%c0_15, %c0_16] : memref<8x1xf32, #tpu.memory_space<vmem>>, vector<8x1xf32>
      tpu.vector_store %arg4[%c0_15, %c0_16], %32 {strides = array<i32>} : memref<8x1xf32, #tpu.memory_space<vmem>>, vector<8x1xf32>,
    } else {
    }
    return
  }
  func.func @transform_0(%arg0: i32, %arg1: i32) -> (i32, i32) {
    %c1_i32 = arith.constant 1 : i32
    %0 = arith.muli %arg0, %c1_i32 : i32
    %1 = arith.addi %0, %arg1 : i32
    %c0_i32 = arith.constant 0 : i32
    %c0_i32_0 = arith.constant 0 : i32
    return %1, %c0_i32 : i32, i32
  }
  func.func @transform_1(%arg0: i32, %arg1: i32) -> (i32, i32) {
    %c1_i32 = arith.constant 1 : i32
    %0 = arith.muli %arg0, %c1_i32 : i32
    %1 = arith.addi %0, %arg1 : i32
    %c0_i32 = arith.constant 0 : i32
    %c0_i32_0 = arith.constant 0 : i32
    return %1, %c0_i32 : i32, i32
  }
  func.func @transform_2(%arg0: i32, %arg1: i32) -> (i32, i32) {
    %c0_i32 = arith.constant 0 : i32
    %c0_i32_0 = arith.constant 0 : i32
    return %arg0, %c0_i32 : i32, i32
  }
}

</mosaic_0001>

<bundles_post_ra>
// kernel: tpu_custom_call.1
= control target key start
LH: loop header
LB: loop body
LE: loop exit
PB: predicated region body
PF: predicated region fallthrough
CT: control target
= control target key end

     0   :  { %vm59_vm0 = vcmask 261120   ;;  %v132_v0 = vmov 0   ;;  %v133_v2 = vmov 0.0   ;;  %v63_v4 = vlaneseq  ;;  %s169_s1 = inlined_call_operand.vmem [shape: s32[16,1], index: 1, kind: input, shape index: {}]   ;;  %s170_s0 = inlined_call_operand.vmem [shape: f32[16,32], index: 0, kind: input, shape index: {}]   ;;  %s171_s2 = inlined_call_operand.vmem [shape: f32[8,1], index: 2, kind: output, shape index: {}]  }
   0x1   :  { %131 = vset.pattern.permute.xlu0 %v132_v0  ;;  %v65_v1 = vld [vmem:[%s169_s1] sm:$0xff]  ;;  %60 = vst.msk [vmem:[#allocation2] sm:$0xff] %vm59_vm0, %v133_v2  ;;  %v66_v3 = vld [vmem:[%s169_s1 + $0x8] sm:$0xff]  ;;  %vm109_vm3 = vcmask 7168  }
   0x2   :  { %68 = vperm.xlu0 %131, %v65_v1   ;;  %v64_v5 = vand.u32 127, %v63_v4  ;;  %v61_v7 = vld [vmem:[%s170_s0] sm:$0xff]  ;;  %v62_v11 = vld [vmem:[%s170_s0 + $0x8] sm:$0xff] }
   0x6   :  { %71 = vperm.xlu0 %131, %v66_v3  }
   0x8   :  { %v95_v17 = vld [vmem:[#allocation2] sm:$0xff] }
  0x7d   :  { %v69_v6 = vpop.permute.xlu0 %68 }
  0x7e   :  { %vm73_vm1 = vcmp.eq.s32.totalorder %v64_v5, %v69_v6 }
  0x7f   :  { %v127_v8 = vsel %vm73_vm1, 1.0, %v133_v2 }
  0x80   :  { %v79_v9 = vsub.f32 %v61_v7, %v127_v8 }
  0x81   :  { %v72_v10 = vpop.permute.xlu0 %71 }
  0x82   :  { %vm74_vm2 = vcmp.eq.s32.totalorder %v64_v5, %v72_v10  ;;  %v81_v13 = vand.u32 2147483647, %v79_v9 }
  0x83   :  { %v128_v12 = vsel %vm74_vm2, 1.0, %v133_v2 }
  0x84   :  { %v80_v14 = vsub.f32 %v62_v11, %v128_v12  ;;  %v97_v16 = vsel %vm59_vm0, %v81_v13, 0.0 }
  0x86   :  { %v82_v15 = vand.u32 2147483647, %v80_v14 }
  0x88   :  { %v98_v18 = vsel %vm59_vm0, %v82_v15, 0.0 }
  0x89   :  { %v99_v19 = vadd.f32 %v98_v18, %v97_v16 }
  0x8b   :  { %v100_v20 = vadd.f32 %v99_v19, %v95_v17 }
  0x8d   :  { %101 = vst.msk [vmem:[#allocation2] sm:$0xff] %vm59_vm0, %v100_v20 }
  0x94   :  { %v105_v21 = vld [vmem:[#allocation2] sm:$0xff] }
  0x95   :  { %v106_v22 = vsel %vm59_vm0, %v105_v21, 0.0 }
  0x96   :  { %107 = vadd.xlane.f32.xlu1 %v106_v22 }
 0x11f   :  { %v108_v23 = vpop.xlane.xlu1 %107 }
 0x120   :  { %110 = vst.msk [vmem:[%s171_s2] sm:$0xff] %vm109_vm3, %v108_v23 }

</bundles_post_ra>
